<compile_context>
chip_gen: v7x
topology: tpu7x:2x2x1
jax: 0.10.0
libtpu: 0.0.40
codegen_flags: <defaults>
</compile_context>

<pallas_src>
import jax
import jax.numpy as jnp
import numpy as np
from jax import lax
from jax.experimental import pallas as pl
from jax.experimental.pallas import tpu as pltpu


def make_kernel(seq_len: int, batch_size: int, time_lag: int):
    S = int(seq_len)
    B = int(batch_size)
    TL = int(time_lag)

    def kernel(sc_ref, x_ref, out_ref):
        # sc_ref (SMEM f32[7]): [c_mean, c_std, Ini_C, w_r_yom, w_r_yfm, w_b1_yom, b0_yom]
        # x_ref  (SMEM f32[B*S]): element (b, t) at index b*S + t
        # out_ref (VMEM f32[B, 4]): per-row [h_n, c_n, Gate_oo, Gate_f]

        # Rows b < time_lag stay zero (reference never touches them). TL is static,
        # so this is a compile-time branch and a single tiny store.
        if TL > 0:
            out_ref[...] = jnp.zeros_like(out_ref)

        mo   = jnp.full((1, 1), sc_ref[0], jnp.float32)
        so   = jnp.full((1, 1), sc_ref[1], jnp.float32)
        c_in = jnp.full((1, 1), sc_ref[2], jnp.float32)
        wom  = jnp.full((1, 1), sc_ref[3], jnp.float32)
        wfm  = jnp.full((1, 1), sc_ref[4], jnp.float32)
        wb1  = jnp.full((1, 1), sc_ref[5], jnp.float32)
        b0   = jnp.full((1, 1), sc_ref[6], jnp.float32)

        # Loop-invariant gate pieces, hoisted out of both loops:
        #   oo(c) = [e^wom/(e^wom+e^wfm)] * sigmoid(b0 + (c - mo)/so * wb1)
        #         = oo1 * sigmoid(c*slope + intercept)
        e_om = jnp.exp(wom)
        e_fm = jnp.exp(wfm)
        oo1 = e_om / (e_om + e_fm)
        slope = wb1 / so
        intercept = b0 - mo * slope

        lane = lax.broadcasted_iota(jnp.int32, (1, 4), 1)

        def gate(c):                                    # (1,1) -> (1,1)
            return oo1 * jax.nn.sigmoid(c * slope + intercept)

        def b_body(b, c):
            base = b * S

            # First S-1 recurrence updates: their per-t output writes are
            # overwritten by later t in the reference, so only the state matters.
            def t_body(t, cc):
                u = x_ref[base + t]                     # scalar SMEM load
                return (1.0 - gate(cc)) * cc + u

            c_mid = lax.fori_loop(0, S - 1, t_body, c, unroll=True)

            # Last timestep: its gate values / pre-update state survive.
            oo = gate(c_mid)
            oo_b = jnp.broadcast_to(oo, (1, 4))
            c_b = jnp.broadcast_to(c_mid, (1, 4))
            row = jnp.where(lane == 0, oo_b * c_b,              # h_n = oo * c
                  jnp.where(lane == 1, c_b,                     # c_n = c
                  jnp.where(lane == 2, oo_b, 1.0 - oo_b)))      # Gate_oo / Gate_f
            out_ref[pl.ds(b, 1), :] = row               # one lane-dense store per b

            u_last = x_ref[base + (S - 1)]
            return (1.0 - oo) * c_mid + u_last          # state carries to next b

        lax.fori_loop(TL, B, b_body, c_in)              # static bounds

    return kernel


def mcpbrnn_gwvariant_routing(params, x, epoch, time_lag, y_obs,
                              c_mean, c_std, ini_c):
    """Forward pass of MCPBRNN_GWVariant_Routing (batch_first x of shape (B, S))."""
    del epoch, y_obs                                    # unused by the reference forward
    x = jnp.asarray(x, jnp.float32)                     # (batch, seq)
    B, S = x.shape
    H = params["weight_r_yom"].shape[0]
    assert H == 1, "reference module semantics require hidden_size == 1"
    TL = int(time_lag)                                  # structural / static parameter

    x_flat = x.reshape(B * S)                           # (b, t) -> b*S + t, no transpose

    sc = jnp.concatenate([
        jnp.asarray([c_mean, c_std, ini_c], jnp.float32),
        jnp.ravel(params["weight_r_yom"]).astype(jnp.float32),
        jnp.ravel(params["weight_r_yfm"]).astype(jnp.float32),
        jnp.ravel(params["weight_b1_yom"]).astype(jnp.float32),
        jnp.ravel(params["bias_b0_yom"]).astype(jnp.float32),
    ])                                                  # (7,)

    smem = pl.BlockSpec(memory_space=pltpu.MemorySpace.SMEM)
    vmem = pl.BlockSpec(memory_space=pltpu.MemorySpace.VMEM)

    out = pl.pallas_call(
        make_kernel(S, B, TL),
        out_shape=jax.ShapeDtypeStruct((B, 4), jnp.float32),
        in_specs=[smem, smem],
        out_specs=vmem,
    )(sc, x_flat)

    h_n = out[:, 0:1]
    c_n = out[:, 1:2]
    gate_oo = out[:, 2:3]
    gate_f = out[:, 3:4]
    return h_n, c_n, gate_oo, gate_f


def _ref_forward_np(params, x, time_lag, c_mean, c_std, ini_c):
    """Float64 NumPy reference mirroring the PyTorch loop (hidden_size == 1)."""
    w_om = float(np.asarray(params["weight_r_yom"]).reshape(()))
    w_fm = float(np.asarray(params["weight_r_yfm"]).reshape(()))
    w_b1 = float(np.asarray(params["weight_b1_yom"]).reshape(()))
    b0 = float(np.asarray(params["bias_b0_yom"]).reshape(()))
    x = np.asarray(x, np.float64)
    B, S = x.shape
    h_n = np.zeros((B, 1)); c_n = np.zeros((B, 1))
    g_oo = np.zeros((B, 1)); g_f = np.zeros((B, 1))
    oo1 = np.exp(w_om) / (np.exp(w_om) + np.exp(w_fm))
    c = float(ini_c)
    for b in range(int(time_lag), B):
        for t in range(S):
            oo = oo1 / (1.0 + np.exp(-(b0 + (c - c_mean) / c_std * w_b1)))
            f = 1.0 - oo
            h_n[b, 0] = oo * c
            c_n[b, 0] = c
            g_oo[b, 0] = oo
            g_f[b, 0] = f
            c = f * c + x[b, t]
    return h_n, c_n, g_oo, g_f


if __name__ == "__main__":
    key = jax.random.PRNGKey(0)
    k = jax.random.split(key, 6)

    H = 1              # hidden_size (reference default; scalar gate math)
    batch = 16         # acts as the outer "time" loop in the reference
    seq = 8
    time_lag = 1
    epoch = 0
    c_mean, c_std, ini_c = 1.5, 0.7, 0.5

    params = {
        "weight_r_yom": jax.random.uniform(k[0], (H, H), jnp.float32),
        "weight_r_yfm": jax.random.uniform(k[1], (H, H), jnp.float32),
        "bias_b0_yom": jax.random.uniform(k[2], (H,), jnp.float32),
        "weight_b1_yom": jax.random.uniform(k[3], (H, H), jnp.float32),
    }

    x = jax.random.uniform(k[4], (batch, seq), jnp.float32) * 3.0
    y_obs = jax.random.uniform(k[5], (batch, 1), jnp.float32) * 2.0  # unused in forward

    outs = mcpbrnn_gwvariant_routing(params, x, epoch, time_lag, y_obs,
                                     c_mean, c_std, ini_c)
    outs = jax.block_until_ready(outs)

    refs = _ref_forward_np(params, np.asarray(x), time_lag, c_mean, c_std, ini_c)
    for got, want in zip(outs, refs):
        np.testing.assert_allclose(np.asarray(got), want, rtol=1e-3, atol=1e-3)

    print("KERNEL_OK")
</pallas_src>

<mosaic_0001>
module attributes {stable_mosaic.version = 11 : i64} {
  func.func @kernel(%arg0: memref<7xf32, #tpu.memory_space<smem>>, %arg1: memref<128xf32, #tpu.memory_space<smem>>, %arg2: memref<16x4xf32, #tpu.memory_space<vmem>>) attributes {dimension_semantics = [], scalar_prefetch = 0 : i64, scratch_operands = 0 : i64, tpu.core_type = #tpu.core_type<tc>} {
    %cst = arith.constant 0.000000e+00 : f32
    %0 = vector.broadcast %cst : f32 to vector<16x4xf32>
    %c0 = arith.constant 0 : index
    %c0_0 = arith.constant 0 : index
    %1 = vector.load %arg2[%c0, %c0_0] : memref<16x4xf32, #tpu.memory_space<vmem>>, vector<16x4xf32>
    tpu.vector_store %arg2[%c0, %c0_0], %0 {strides = array<i32>} : memref<16x4xf32, #tpu.memory_space<vmem>>, vector<16x4xf32>,
    %c0_1 = arith.constant 0 : index
    %2 = memref.load %arg0[%c0_1] : memref<7xf32, #tpu.memory_space<smem>>
    %3 = vector.broadcast %2 : f32 to vector<1x1xf32>
    %c1 = arith.constant 1 : index
    %4 = memref.load %arg0[%c1] : memref<7xf32, #tpu.memory_space<smem>>
    %5 = vector.broadcast %4 : f32 to vector<1x1xf32>
    %c2 = arith.constant 2 : index
    %6 = memref.load %arg0[%c2] : memref<7xf32, #tpu.memory_space<smem>>
    %7 = vector.broadcast %6 : f32 to vector<1x1xf32>
    %c3 = arith.constant 3 : index
    %8 = memref.load %arg0[%c3] : memref<7xf32, #tpu.memory_space<smem>>
    %9 = vector.broadcast %8 : f32 to vector<1x1xf32>
    %c4 = arith.constant 4 : index
    %10 = memref.load %arg0[%c4] : memref<7xf32, #tpu.memory_space<smem>>
    %11 = vector.broadcast %10 : f32 to vector<1x1xf32>
    %c5 = arith.constant 5 : index
    %12 = memref.load %arg0[%c5] : memref<7xf32, #tpu.memory_space<smem>>
    %13 = vector.broadcast %12 : f32 to vector<1x1xf32>
    %c6 = arith.constant 6 : index
    %14 = memref.load %arg0[%c6] : memref<7xf32, #tpu.memory_space<smem>>
    %15 = vector.broadcast %14 : f32 to vector<1x1xf32>
    %16 = math.exp %9 : vector<1x1xf32>
    %17 = math.exp %11 : vector<1x1xf32>
    %18 = arith.addf %16, %17 : vector<1x1xf32>
    %19 = arith.divf %16, %18 : vector<1x1xf32>
    %20 = arith.divf %13, %5 : vector<1x1xf32>
    %21 = arith.mulf %3, %20 : vector<1x1xf32>
    %22 = arith.subf %15, %21 : vector<1x1xf32>
    %23 = tpu.iota {dimensions = array<i32: 1>} : vector<1x4xi32>
    %c1_i32 = arith.constant 1 : i32
    %c15_i32 = arith.constant 15 : i32
    %24 = arith.addi %c1_i32, %c15_i32 : i32
    %c1_i32_2 = arith.constant 1 : i32
    %25 = scf.for %arg3 = %c1_i32 to %24 step %c1_i32_2 iter_args(%arg4 = %7) -> (vector<1x1xf32>)  : i32 {
      %c8_i32 = arith.constant 8 : i32
      %26 = arith.muli %arg3, %c8_i32 : i32
      %c0_i32 = arith.constant 0 : i32
      %27 = arith.addi %26, %c0_i32 : i32
      %28 = arith.index_cast %27 : i32 to index
      %29 = memref.load %arg1[%28] : memref<128xf32, #tpu.memory_space<smem>>
      %30 = arith.mulf %arg4, %20 : vector<1x1xf32>
      %31 = arith.addf %30, %22 : vector<1x1xf32>
      %32 = arith.negf %31 : vector<1x1xf32>
      %33 = math.exp %32 : vector<1x1xf32>
      %cst_4 = arith.constant 1.000000e+00 : f32
      %34 = vector.broadcast %cst_4 : f32 to vector<1x1xf32>
      %35 = arith.addf %34, %33 : vector<1x1xf32>
      %36 = arith.divf %34, %35 : vector<1x1xf32>
      %37 = arith.mulf %19, %36 : vector<1x1xf32>
      %cst_5 = arith.constant 1.000000e+00 : f32
      %38 = vector.broadcast %cst_5 : f32 to vector<1x1xf32>
      %39 = arith.subf %38, %37 : vector<1x1xf32>
      %40 = arith.mulf %39, %arg4 : vector<1x1xf32>
      %41 = vector.broadcast %29 : f32 to vector<1x1xf32>
      %42 = arith.addf %40, %41 : vector<1x1xf32>
      %c1_i32_6 = arith.constant 1 : i32
      %43 = arith.addi %26, %c1_i32_6 : i32
      %44 = arith.index_cast %43 : i32 to index
      %45 = memref.load %arg1[%44] : memref<128xf32, #tpu.memory_space<smem>>
      %46 = arith.mulf %42, %20 : vector<1x1xf32>
      %47 = arith.addf %46, %22 : vector<1x1xf32>
      %48 = arith.negf %47 : vector<1x1xf32>
      %49 = math.exp %48 : vector<1x1xf32>
      %cst_7 = arith.constant 1.000000e+00 : f32
      %50 = vector.broadcast %cst_7 : f32 to vector<1x1xf32>
      %51 = arith.addf %50, %49 : vector<1x1xf32>
      %52 = arith.divf %50, %51 : vector<1x1xf32>
      %53 = arith.mulf %19, %52 : vector<1x1xf32>
      %cst_8 = arith.constant 1.000000e+00 : f32
      %54 = vector.broadcast %cst_8 : f32 to vector<1x1xf32>
      %55 = arith.subf %54, %53 : vector<1x1xf32>
      %56 = arith.mulf %55, %42 : vector<1x1xf32>
      %57 = vector.broadcast %45 : f32 to vector<1x1xf32>
      %58 = arith.addf %56, %57 : vector<1x1xf32>
      %c2_i32 = arith.constant 2 : i32
      %59 = arith.addi %26, %c2_i32 : i32
      %60 = arith.index_cast %59 : i32 to index
      %61 = memref.load %arg1[%60] : memref<128xf32, #tpu.memory_space<smem>>
      %62 = arith.mulf %58, %20 : vector<1x1xf32>
      %63 = arith.addf %62, %22 : vector<1x1xf32>
      %64 = arith.negf %63 : vector<1x1xf32>
      %65 = math.exp %64 : vector<1x1xf32>
      %cst_9 = arith.constant 1.000000e+00 : f32
      %66 = vector.broadcast %cst_9 : f32 to vector<1x1xf32>
      %67 = arith.addf %66, %65 : vector<1x1xf32>
      %68 = arith.divf %66, %67 : vector<1x1xf32>
      %69 = arith.mulf %19, %68 : vector<1x1xf32>
      %cst_10 = arith.constant 1.000000e+00 : f32
      %70 = vector.broadcast %cst_10 : f32 to vector<1x1xf32>
      %71 = arith.subf %70, %69 : vector<1x1xf32>
      %72 = arith.mulf %71, %58 : vector<1x1xf32>
      %73 = vector.broadcast %61 : f32 to vector<1x1xf32>
      %74 = arith.addf %72, %73 : vector<1x1xf32>
      %c3_i32 = arith.constant 3 : i32
      %75 = arith.addi %26, %c3_i32 : i32
      %76 = arith.index_cast %75 : i32 to index
      %77 = memref.load %arg1[%76] : memref<128xf32, #tpu.memory_space<smem>>
      %78 = arith.mulf %74, %20 : vector<1x1xf32>
      %79 = arith.addf %78, %22 : vector<1x1xf32>
      %80 = arith.negf %79 : vector<1x1xf32>
      %81 = math.exp %80 : vector<1x1xf32>
      %cst_11 = arith.constant 1.000000e+00 : f32
      %82 = vector.broadcast %cst_11 : f32 to vector<1x1xf32>
      %83 = arith.addf %82, %81 : vector<1x1xf32>
      %84 = arith.divf %82, %83 : vector<1x1xf32>
      %85 = arith.mulf %19, %84 : vector<1x1xf32>
      %cst_12 = arith.constant 1.000000e+00 : f32
      %86 = vector.broadcast %cst_12 : f32 to vector<1x1xf32>
      %87 = arith.subf %86, %85 : vector<1x1xf32>
      %88 = arith.mulf %87, %74 : vector<1x1xf32>
      %89 = vector.broadcast %77 : f32 to vector<1x1xf32>
      %90 = arith.addf %88, %89 : vector<1x1xf32>
      %c4_i32 = arith.constant 4 : i32
      %91 = arith.addi %26, %c4_i32 : i32
      %92 = arith.index_cast %91 : i32 to index
      %93 = memref.load %arg1[%92] : memref<128xf32, #tpu.memory_space<smem>>
      %94 = arith.mulf %90, %20 : vector<1x1xf32>
      %95 = arith.addf %94, %22 : vector<1x1xf32>
      %96 = arith.negf %95 : vector<1x1xf32>
      %97 = math.exp %96 : vector<1x1xf32>
      %cst_13 = arith.constant 1.000000e+00 : f32
      %98 = vector.broadcast %cst_13 : f32 to vector<1x1xf32>
      %99 = arith.addf %98, %97 : vector<1x1xf32>
      %100 = arith.divf %98, %99 : vector<1x1xf32>
      %101 = arith.mulf %19, %100 : vector<1x1xf32>
      %cst_14 = arith.constant 1.000000e+00 : f32
      %102 = vector.broadcast %cst_14 : f32 to vector<1x1xf32>
      %103 = arith.subf %102, %101 : vector<1x1xf32>
      %104 = arith.mulf %103, %90 : vector<1x1xf32>
      %105 = vector.broadcast %93 : f32 to vector<1x1xf32>
      %106 = arith.addf %104, %105 : vector<1x1xf32>
      %c5_i32 = arith.constant 5 : i32
      %107 = arith.addi %26, %c5_i32 : i32
      %108 = arith.index_cast %107 : i32 to index
      %109 = memref.load %arg1[%108] : memref<128xf32, #tpu.memory_space<smem>>
      %110 = arith.mulf %106, %20 : vector<1x1xf32>
      %111 = arith.addf %110, %22 : vector<1x1xf32>
      %112 = arith.negf %111 : vector<1x1xf32>
      %113 = math.exp %112 : vector<1x1xf32>
      %cst_15 = arith.constant 1.000000e+00 : f32
      %114 = vector.broadcast %cst_15 : f32 to vector<1x1xf32>
      %115 = arith.addf %114, %113 : vector<1x1xf32>
      %116 = arith.divf %114, %115 : vector<1x1xf32>
      %117 = arith.mulf %19, %116 : vector<1x1xf32>
      %cst_16 = arith.constant 1.000000e+00 : f32
      %118 = vector.broadcast %cst_16 : f32 to vector<1x1xf32>
      %119 = arith.subf %118, %117 : vector<1x1xf32>
      %120 = arith.mulf %119, %106 : vector<1x1xf32>
      %121 = vector.broadcast %109 : f32 to vector<1x1xf32>
      %122 = arith.addf %120, %121 : vector<1x1xf32>
      %c6_i32 = arith.constant 6 : i32
      %123 = arith.addi %26, %c6_i32 : i32
      %124 = arith.index_cast %123 : i32 to index
      %125 = memref.load %arg1[%124] : memref<128xf32, #tpu.memory_space<smem>>
      %126 = arith.mulf %122, %20 : vector<1x1xf32>
      %127 = arith.addf %126, %22 : vector<1x1xf32>
      %128 = arith.negf %127 : vector<1x1xf32>
      %129 = math.exp %128 : vector<1x1xf32>
      %cst_17 = arith.constant 1.000000e+00 : f32
      %130 = vector.broadcast %cst_17 : f32 to vector<1x1xf32>
      %131 = arith.addf %130, %129 : vector<1x1xf32>
      %132 = arith.divf %130, %131 : vector<1x1xf32>
      %133 = arith.mulf %19, %132 : vector<1x1xf32>
      %cst_18 = arith.constant 1.000000e+00 : f32
      %134 = vector.broadcast %cst_18 : f32 to vector<1x1xf32>
      %135 = arith.subf %134, %133 : vector<1x1xf32>
      %136 = arith.mulf %135, %122 : vector<1x1xf32>
      %137 = vector.broadcast %125 : f32 to vector<1x1xf32>
      %138 = arith.addf %136, %137 : vector<1x1xf32>
      %c7_i32 = arith.constant 7 : i32
      %139 = arith.mulf %138, %20 : vector<1x1xf32>
      %140 = arith.addf %139, %22 : vector<1x1xf32>
      %141 = arith.negf %140 : vector<1x1xf32>
      %142 = math.exp %141 : vector<1x1xf32>
      %cst_19 = arith.constant 1.000000e+00 : f32
      %143 = vector.broadcast %cst_19 : f32 to vector<1x1xf32>
      %144 = arith.addf %143, %142 : vector<1x1xf32>
      %145 = arith.divf %143, %144 : vector<1x1xf32>
      %146 = arith.mulf %19, %145 : vector<1x1xf32>
      %147 = vector.shape_cast %146 : vector<1x1xf32> to vector<1x1xf32>
      %148 = vector.broadcast %147 : vector<1x1xf32> to vector<1x4xf32>
      %149 = vector.shape_cast %138 : vector<1x1xf32> to vector<1x1xf32>
      %150 = vector.broadcast %149 : vector<1x1xf32> to vector<1x4xf32>
      %c0_i32_20 = arith.constant 0 : i32
      %151 = vector.broadcast %c0_i32_20 : i32 to vector<1x4xi32>
      %152 = arith.cmpi eq, %23, %151 : vector<1x4xi32>
      %153 = arith.mulf %148, %150 : vector<1x4xf32>
      %c1_i32_21 = arith.constant 1 : i32
      %154 = vector.broadcast %c1_i32_21 : i32 to vector<1x4xi32>
      %155 = arith.cmpi eq, %23, %154 : vector<1x4xi32>
      %c2_i32_22 = arith.constant 2 : i32
      %156 = vector.broadcast %c2_i32_22 : i32 to vector<1x4xi32>
      %157 = arith.cmpi eq, %23, %156 : vector<1x4xi32>
      %cst_23 = arith.constant 1.000000e+00 : f32
      %158 = vector.broadcast %cst_23 : f32 to vector<1x4xf32>
      %159 = arith.subf %158, %148 : vector<1x4xf32>
      %160 = arith.select %157, %148, %159 : vector<1x4xi1>, vector<1x4xf32>
      %161 = arith.select %155, %150, %160 : vector<1x4xi1>, vector<1x4xf32>
      %162 = arith.select %152, %153, %161 : vector<1x4xi1>, vector<1x4xf32>
      %163 = arith.index_cast %arg3 : i32 to index
      %c0_24 = arith.constant 0 : index
      %164 = vector.load %arg2[%163, %c0_24] : memref<16x4xf32, #tpu.memory_space<vmem>>, vector<1x4xf32>
      tpu.vector_store %arg2[%163, %c0_24], %162 {strides = array<i32>} : memref<16x4xf32, #tpu.memory_space<vmem>>, vector<1x4xf32>,
      %c7_i32_25 = arith.constant 7 : i32
      %165 = arith.addi %26, %c7_i32_25 : i32
      %166 = arith.index_cast %165 : i32 to index
      %167 = memref.load %arg1[%166] : memref<128xf32, #tpu.memory_space<smem>>
      %cst_26 = arith.constant 1.000000e+00 : f32
      %168 = vector.broadcast %cst_26 : f32 to vector<1x1xf32>
      %169 = arith.subf %168, %146 : vector<1x1xf32>
      %170 = arith.mulf %169, %138 : vector<1x1xf32>
      %171 = vector.broadcast %167 : f32 to vector<1x1xf32>
      %172 = arith.addf %170, %171 : vector<1x1xf32>
      scf.yield %172 : vector<1x1xf32>
    }
    %c15_i32_3 = arith.constant 15 : i32
    return
  }
}

</mosaic_0001>

<bundles_post_ra>
// kernel: tpu_custom_call.1
= control target key start
LH: loop header
LB: loop body
LE: loop exit
PB: predicated region body
PF: predicated region fallthrough
CT: control target
= control target key end

     0   :  { %7 = vsyncpa [#allocation3], 0  ;;  %s435_s0 = inlined_call_operand.hbm [shape: f32[7], index: 0, kind: input, shape index: {}]   ;;  %s436_s1 = inlined_call_operand.vmem [shape: f32[128], index: 1, kind: input, shape index: {}]   ;;  %s437_s2 = inlined_call_operand.vmem [shape: f32[16,4], index: 2, kind: output, shape index: {}]  }
   0x1   :  { %8 = vsyncpa [#allocation4], 0  ;;  %s23_s11 = sshll.u32 %s436_s1, 4  ;;  %s290_s14 = scalar_lea.hbm %s435_s0, 16  ;;  %s24_s11 = int_to_ptr.vmem [resolvable:$true] %s23_s11 }
   0x2   :  { %p291_p0 = scmp.ne.s32.totalorder %s435_s0, %s290_s14  ;;  %p294_p1 = scmp.lt.u32.totalorder %s290_s14, %s435_s0 }
   0x4   :  { %p296_p2 = pnand %p294_p1, %p291_p0 }
   0x6   :  { %299 = shalt.err (!%p296_p2)
}
   0x7   :  { %s332_s19 = smov [#allocation2]   ;;  %s300_s1 = scalar_lea.vmem %s24_s11, 16 }
   0x8   :  { %16 = dma.hbm_to_smem %s435_s0, 16, %s332_s19, [#allocation3]  }
   0x9   :  { %p301_p3 = scmp.ne.s32.totalorder %s24_s11, %s300_s1  ;;  %p305_p4 = scmp.lt.s32.totalorder %s24_s11, %s24_s11 }
   0xa   :  { %p306_p5 = scmp.lt.s32.totalorder %s300_s1, %s300_s1 }
   0xc   :  { %p307_p6 = por %p306_p5, %p305_p4 }
   0xe   :  { %p308_p7 = pnand %p307_p6, %p301_p3 }
  0x10   :  { %311 = shalt.err (!%p308_p7)
}
  0x11   :  { %s333_s22 = smov [#allocation5]  }
  0x12   :  { %26 = dma.vmem_to_smem %s24_s11, 16, %s333_s22, [#allocation4]  }
  0x13   :  { %320 = dma.done.wait [#allocation3], 16  }
  0x14   :  { %321 = vsyncadd [#allocation3], 4294967280 }
  0x15   :  { %322 = dma.done.wait [#allocation4], 16  }
  0x16   :  { %323 = vsyncadd [#allocation4], 4294967280 }
  0x17   :  { %33 = sfence }
  0x18   :  { %vm34_vm0 = vcmask 31744   ;;  %s216_s23 = sld [smem:[#allocation2 + $0x1]]  ;;  %v62_v0 = vlaneseq  ;;  %v334_v1 = vmov 0.0   ;;  %s217_s27 = sld [smem:[#allocation2 + $0x2]] }
  0x19   :  { %35 = vst.msk [vmem:[%s437_s2] sm:$0xff] %vm34_vm0, %v334_v1  ;;  %36 = vst.msk [vmem:[%s437_s2 + $0x8] sm:$0xff] %vm34_vm0, %v334_v1  ;;  %s218_s28 = sld [smem:[#allocation2 + $0x3]]  ;;  %s219_s29 = sld [smem:[#allocation2 + $0x4]] }
  0x1a   :  { %v371_v2 = vand.u32 127, %v62_v0  ;;  %s220_s30 = sld [smem:[#allocation2 + $0x5]]  ;;  %s37_s3 = sld [smem:[#allocation2]] }
  0x1b   :  { %s221_s4 = sld [smem:[#allocation2 + $0x6]]  ;;  %s382_s5 = smov 1  }
  0x1e   :  { %v40_v3 = vstv %s216_s23  ;;  %v42_v4 = vstv %s217_s27  }
  0x1f   :  { %v44_v5 = vstv %s218_s28  ;;  %250 = vrcp.f32 %v40_v3  ;;  %v46_v6 = vstv %s219_s29 }
  0x20   :  { %v51_v7 = vmul.f32 1.442695, %v44_v5  ;;  %v53_v8 = vmul.f32 1.442695, %v46_v6  ;;  %v48_v9 = vstv %s220_s30  ;;  %v38_v11 = vstv %s37_s3 }
  0x21   :  { %v50_v13 = vstv %s221_s4 }
  0x22   :  { %252 = vpow2.f32 %v51_v7 }
  0x23   :  { %254 = vpow2.f32 %v53_v8 }
  0x29   :  { %v251_v10 = vpop.eup %250 }
  0x2a   :  { %v373_v12 = vmul.f32 %v251_v10, %v48_v9 }
  0x2c   :  { %v253_v14 = vpop.eup %252  ;;  %v60_v15 = vmul.f32 %v373_v12, %v38_v11 }
  0x2d   :  { %v255_v16 = vpop.eup %254 }
  0x2e   :  { %v55_v17 = vadd.f32 %v255_v16, %v253_v14  ;;  %v376_v18 = vsub.f32 %v50_v13, %v60_v15 }
  0x30   :  { %256 = vrcp.f32 %v55_v17 }
  0x3a   :  { %v257_v19 = vpop.eup %256 }
  0x3b   :  { %v378_v20 = vmul.f32 %v257_v19, %v253_v14 }
  0x3c LB: > { %v73_v21 = vmul.f32 %v326_v4, %v373_v12  ;;  %s391_s6 = sshll.u32 %s330_s5, 3  ;;  %vm188_vm1 = vcmp.eq.s32.totalorder %v371_v2, 2  ;;  %vm187_vm2 = vcmp.eq.s32.totalorder %v371_v2, 1  ;;  %vm185_vm3 = vcmp.eq.s32.totalorder %v371_v2, 0  ;;  %s193_s23 = scalar_lea.vmem %s437_s2, %s330_s5  ;;  %s330_s5 = sphi %s382_s5, %s69_s5   ;;  %v326_v4 = vphi %v42_v4, %v200_v4  }
  0x3d   : > { %s72_s7 = sld [smem:[#allocation5 + %s391_s6]]  ;;  %s86_s8 = sadd.s32 1, %s391_s6  ;;  %vm194_vm4 = vcmask 24576  }
  0x3e   : > { %v74_v22 = vadd.f32 %v73_v21, %v376_v18  ;;  %s87_s9 = sld [smem:[#allocation5 + %s86_s8]]  ;;  %s101_s10 = sadd.s32 2, %s391_s6 }
  0x3f   : > { %s102_s11 = sld [smem:[#allocation5 + %s101_s10]]  ;;  %s116_s12 = sadd.s32 3, %s391_s6 }
  0x40   : > { %v223_v23 = vmul.f32 -1.442695, %v74_v22  ;;  %s117_s13 = sld [smem:[#allocation5 + %s116_s12]]  ;;  %s131_s14 = sadd.s32 4, %s391_s6 }
  0x41   : > { %s132_s15 = sld [smem:[#allocation5 + %s131_s14]]  ;;  %s146_s16 = sadd.s32 5, %s391_s6 }
  0x42   : > { %258 = vpow2.f32 %v223_v23  ;;  %s147_s17 = sld [smem:[#allocation5 + %s146_s16]]  ;;  %s161_s18 = sadd.s32 6, %s391_s6 }
  0x43   : > { %v84_v29 = vstv %s72_s7  ;;  %s162_s19 = sld [smem:[#allocation5 + %s161_s18]]  ;;  %s196_s20 = sadd.s32 7, %s391_s6 }
  0x44   : > { %v99_v40 = vstv %s87_s9  ;;  %s197_s21 = sld [smem:[#allocation5 + %s196_s20]]  ;;  %s69_s5 = sadd.s32 1, %s330_s5  }
  0x45   : > { %v114_v51 = vstv %s102_s11  ;;  %p66_p8 = scmp.ge.s32.totalorder %s69_s5, 16  }
  0x46   : > { %v129_v62 = vstv %s117_s13 }
  0x47   : > { %v144_v10 = vstv %s132_s15 }
  0x4c   : > { %v259_v24 = vpop.eup %258 }
  0x4d   : > { %v78_v25 = vadd.f32 1.0, %v259_v24  ;;  %v159_v24 = vstv %s147_s17 }
  0x4f   : > { %260 = vrcp.f32 %v78_v25 }
  0x59   : > { %v261_v26 = vpop.eup %260 }
  0x5a   : > { %v81_v27 = vmul.f32 %v261_v26, %v378_v20 }
  0x5c   : > { %v82_v28 = vsub.f32 1.0, %v81_v27 }
  0x5e   : > { %v83_v30 = vmul.f32 %v326_v4, %v82_v28 }
  0x60   : > { %v85_v31 = vadd.f32 %v84_v29, %v83_v30 }
  0x62   : > { %v88_v32 = vmul.f32 %v85_v31, %v373_v12 }
  0x64   : > { %v89_v33 = vadd.f32 %v88_v32, %v376_v18 }
  0x66   : > { %v224_v34 = vmul.f32 -1.442695, %v89_v33 }
  0x68   : > { %262 = vpow2.f32 %v224_v34 }
  0x72   : > { %v263_v35 = vpop.eup %262 }
  0x73   : > { %v93_v36 = vadd.f32 1.0, %v263_v35  ;;  %v174_v35 = vstv %s162_s19 }
  0x75   : > { %264 = vrcp.f32 %v93_v36 }
  0x7f   : > { %v265_v37 = vpop.eup %264 }
  0x80   : > { %v96_v38 = vmul.f32 %v265_v37, %v378_v20 }
  0x82   : > { %v97_v39 = vsub.f32 1.0, %v96_v38 }
  0x84   : > { %v98_v41 = vmul.f32 %v97_v39, %v85_v31 }
  0x86   : > { %v100_v42 = vadd.f32 %v99_v40, %v98_v41 }
  0x88   : > { %v103_v43 = vmul.f32 %v100_v42, %v373_v12 }
  0x8a   : > { %v104_v44 = vadd.f32 %v103_v43, %v376_v18 }
  0x8c   : > { %v225_v45 = vmul.f32 -1.442695, %v104_v44 }
  0x8e   : > { %266 = vpow2.f32 %v225_v45 }
  0x98   : > { %v267_v46 = vpop.eup %266 }
  0x99   : > { %v108_v47 = vadd.f32 1.0, %v267_v46 }
  0x9b   : > { %268 = vrcp.f32 %v108_v47  ;;  %v199_v47 = vstv %s197_s21 }
  0xa5   : > { %v269_v48 = vpop.eup %268 }
  0xa6   : > { %v111_v49 = vmul.f32 %v269_v48, %v378_v20 }
  0xa8   : > { %v112_v50 = vsub.f32 1.0, %v111_v49 }
  0xaa   : > { %v113_v52 = vmul.f32 %v112_v50, %v100_v42 }
  0xac   : > { %v115_v53 = vadd.f32 %v114_v51, %v113_v52 }
  0xae   : > { %v118_v54 = vmul.f32 %v115_v53, %v373_v12 }
  0xb0   : > { %v119_v55 = vadd.f32 %v118_v54, %v376_v18 }
  0xb2   : > { %v226_v56 = vmul.f32 -1.442695, %v119_v55 }
  0xb4   : > { %270 = vpow2.f32 %v226_v56 }
  0xbe   : > { %v271_v57 = vpop.eup %270 }
  0xbf   : > { %v123_v58 = vadd.f32 1.0, %v271_v57 }
  0xc1   : > { %272 = vrcp.f32 %v123_v58 }
  0xcb   : > { %v273_v59 = vpop.eup %272 }
  0xcc   : > { %v126_v60 = vmul.f32 %v273_v59, %v378_v20 }
  0xce   : > { %v127_v61 = vsub.f32 1.0, %v126_v60 }
  0xd0   : > { %v128_v63 = vmul.f32 %v127_v61, %v115_v53 }
  0xd2   : > { %v130_v0 = vadd.f32 %v129_v62, %v128_v63 }
  0xd4   : > { %v133_v1 = vmul.f32 %v130_v0, %v373_v12 }
  0xd6   : > { %v134_v3 = vadd.f32 %v133_v1, %v376_v18 }
  0xd8   : > { %v227_v4 = vmul.f32 -1.442695, %v134_v3 }
  0xda   : > { %274 = vpow2.f32 %v227_v4 }
  0xe4   : > { %v275_v5 = vpop.eup %274 }
  0xe5   : > { %v138_v6 = vadd.f32 1.0, %v275_v5 }
  0xe7   : > { %276 = vrcp.f32 %v138_v6 }
  0xf1   : > { %v277_v7 = vpop.eup %276 }
  0xf2   : > { %v141_v8 = vmul.f32 %v277_v7, %v378_v20 }
  0xf4   : > { %v142_v9 = vsub.f32 1.0, %v141_v8 }
  0xf6   : > { %v143_v11 = vmul.f32 %v142_v9, %v130_v0 }
  0xf8   : > { %v145_v13 = vadd.f32 %v144_v10, %v143_v11 }
  0xfa   : > { %v148_v14 = vmul.f32 %v145_v13, %v373_v12 }
  0xfc   : > { %v149_v15 = vadd.f32 %v148_v14, %v376_v18 }
  0xfe   : > { %v228_v16 = vmul.f32 -1.442695, %v149_v15 }
 0x100   : > { %278 = vpow2.f32 %v228_v16 }
 0x10a   : > { %v279_v17 = vpop.eup %278 }
 0x10b   : > { %v153_v19 = vadd.f32 1.0, %v279_v17 }
 0x10d   : > { %280 = vrcp.f32 %v153_v19 }
 0x117   : > { %v281_v21 = vpop.eup %280 }
 0x118   : > { %v156_v22 = vmul.f32 %v281_v21, %v378_v20 }
 0x11a   : > { %v157_v23 = vsub.f32 1.0, %v156_v22 }
 0x11c   : > { %v158_v25 = vmul.f32 %v157_v23, %v145_v13 }
 0x11e   : > { %v160_v26 = vadd.f32 %v159_v24, %v158_v25 }
 0x120   : > { %v163_v27 = vmul.f32 %v160_v26, %v373_v12 }
 0x122   : > { %v164_v28 = vadd.f32 %v163_v27, %v376_v18 }
 0x124   : > { %v229_v29 = vmul.f32 -1.442695, %v164_v28 }
 0x126   : > { %282 = vpow2.f32 %v229_v29 }
 0x130   : > { %v283_v30 = vpop.eup %282 }
 0x131   : > { %v168_v31 = vadd.f32 1.0, %v283_v30 }
 0x133   : > { %284 = vrcp.f32 %v168_v31 }
 0x13d   : > { %v285_v32 = vpop.eup %284 }
 0x13e   : > { %v171_v33 = vmul.f32 %v285_v32, %v378_v20 }
 0x140   : > { %v172_v34 = vsub.f32 1.0, %v171_v33 }
 0x142   : > { %v173_v36 = vmul.f32 %v172_v34, %v160_v26 }
 0x144   : > { %v175_v37 = vadd.f32 %v174_v35, %v173_v36 }
 0x146   : > { %v176_v38 = vmul.f32 %v175_v37, %v373_v12 }
 0x148   : > { %v177_v39 = vadd.f32 %v176_v38, %v376_v18 }
 0x14a   : > { %v230_v40 = vmul.f32 -1.442695, %v177_v39 }
 0x14c   : > { %286 = vpow2.f32 %v230_v40 }
 0x156   : > { %v287_v41 = vpop.eup %286 }
 0x157   : > { %v181_v42 = vadd.f32 1.0, %v287_v41 }
 0x159   : > { %288 = vrcp.f32 %v181_v42 }
 0x163   : > { %v289_v43 = vpop.eup %288 }
 0x164   : > { %v184_v44 = vmul.f32 %v289_v43, %v378_v20 }
 0x165   :  { %68 = sbr.rel (!%p66_p8) target bundleno = 60 (0x3c), region = 44 }
 0x166   : > { %v186_v45 = vmul.f32 %v184_v44, %v175_v37  ;;  %v189_v46 = vsub.f32 1.0, %v184_v44 }
 0x168   : > { %v190_v48 = vsel %vm188_vm1, %v184_v44, %v189_v46  ;;  %v198_v49 = vmul.f32 %v189_v46, %v175_v37 }
 0x169   : > { %v191_v50 = vsel %vm187_vm2, %v175_v37, %v190_v48 }
 0x16a   : > { %v192_v51 = vsel %vm185_vm3, %v186_v45, %v191_v50  ;;  %v200_v4 = vadd.f32 %v199_v47, %v198_v49  }
 0x16b   : > { %195 = vst.msk [vmem:[%s193_s23] sm:$0x1] %vm194_vm4, %v192_v51 }
 0x16c   :  { %205 = vsyncpa [#allocation3], 1 }
 0x16d   :  { %206 = vsyncpa [#allocation4], 1 }

</bundles_post_ra>
